<compile_context>
chip_gen: v5e
topology: v5e:2x2
jax: 0.10.0
libtpu: 0.0.40
codegen_flags: <defaults>
</compile_context>

<pallas_src>
import math

import jax
import jax.numpy as jnp
from jax.experimental import pallas as pl
from jax.experimental.pallas import tpu as pltpu


# ---------------------------------------------------------------------------
# Fused (4-head) 1x1 conv + BN(eval) + ReLU kernel:  out = relu(W_fused @ x_slab + b_fused)
# ---------------------------------------------------------------------------
def _fused_conv1x1_bn_relu_kernel(x_ref, w_ref, b_ref, o_ref):
    # x_ref: (C_in, TL) lane-dense spatial slab, w_ref: (co_tile, C_in),
    # b_ref: (co_tile, 1) f32, o_ref: (co_tile, TL).
    acc = jnp.dot(w_ref[...], x_ref[...], preferred_element_type=jnp.float32)
    acc = acc + b_ref[...]                       # conv-bias + BN shift (lane broadcast), f32
    o_ref[...] = jnp.maximum(acc, 0.0).astype(o_ref.dtype)


def _vmem_budget_bytes():
    """Chip-aware scoped-VMEM limit and data budget (headroom left for compiler scratch)."""
    try:
        phys = pltpu.get_tpu_info().vmem_capacity_bytes
    except Exception:
        phys = 64 * 1024 * 1024                  # conservative (v7x-sized) fallback
    vmem_limit = int(min(phys * 3 // 4, 100 * 1024 * 1024))   # 48 MiB v7x, 96 MiB v5e/v6e
    data_budget = max(vmem_limit - 6 * 1024 * 1024, 8 * 1024 * 1024)
    return vmem_limit, data_budget


def fused_bottleneck_conv1(x_nchw, w_fused, b_fused, *, compute_dtype=None,
                           single_buffer_weights=True, tl_target=2048):
    """Fused BottleNeck_Layer_conv1 forward for all heads at once.

    x_nchw:  (N, C_in, H, W)
    w_fused: (C_out_total, C_in)  -- all heads' conv weights with BN scale folded in
    b_fused: (C_out_total,)       -- all heads' conv bias with BN shift folded in (f32)
    returns: (N, C_out_total, H, W) in the compute dtype.
    """
    N, C_in, H, W = x_nchw.shape
    C_out = w_fused.shape[0]
    HW = H * W
    dtype = jnp.dtype(compute_dtype) if compute_dtype is not None else jnp.dtype(x_nchw.dtype)
    itemsize = dtype.itemsize

    x = x_nchw.astype(dtype)
    w = w_fused.astype(dtype)                    # MXU operand in the compute dtype (bf16 ok)
    b2 = b_fused.reshape(C_out, 1).astype(jnp.float32)

    vmem_limit, data_budget = _vmem_budget_bytes()

    per_batch = (HW % 128 == 0) or (HW >= 1024)
    if per_batch:
        # NCHW-native: (N, C_in, HW); no pad, no transpose.
        x_op = x.reshape(N, C_in, HW)
        lane_len = HW
        lane_cap = (HW // 128) * 128             # lane block must be a multiple of 128
    else:
        # Small maps: lane-pack batch into the spatial axis -> (C_in, N*HW), ~full lanes.
        L = N * HW
        L_pad = pl.cdiv(L, 128) * 128
        x_op = x.reshape(N, C_in, HW).transpose(1, 0, 2).reshape(C_in, L)
        if L_pad != L:
            x_op = jnp.pad(x_op, ((0, 0), (0, L_pad - L)))
        lane_len = L_pad
        lane_cap = L_pad

    # Lane tile: multiple of 128, as large as the VMEM data budget allows.
    def footprint(t, co_t):
        return (2 * (C_in + co_t) * t * itemsize          # double-buffered x + out tiles
                + 2 * co_t * C_in * itemsize + 2 * co_t * 4)  # (conservative) 2x weight + bias

    tl = min(max(128, (tl_target // 128) * 128), lane_cap)
    while tl > 128 and footprint(tl, C_out) > data_budget:
        tl -= 128

    num_lane = pl.cdiv(lane_len, tl)
    base_grid = (N * num_lane) if per_batch else num_lane

    # C_out axis: usually one tile.  Split in two when the rest of the grid cannot feed two
    # TensorCores (v7x) or the weight double-buffer would eat too much of the VMEM budget.
    co_tile = C_out
    if C_out % 64 == 0 and (base_grid < 2 or 2 * C_out * C_in * itemsize > data_budget // 2):
        co_tile = C_out // 2
    num_co = C_out // co_tile

    wb_kwargs = {}
    if single_buffer_weights and num_co == 1 and hasattr(pl, "Buffered"):
        # grid-invariant operands: single buffer halves their VMEM footprint
        wb_kwargs = dict(pipeline_mode=pl.Buffered(1))

    cost = pl.CostEstimate(
        flops=2 * N * C_out * C_in * HW,
        transcendentals=0,
        bytes_accessed=(x_op.size + w.size) * itemsize + b2.size * 4
                       + N * C_out * HW * itemsize)

    if per_batch:
        grid = (N, num_lane, num_co)             # co innermost: x tile reused across C_out tiles
        in_specs = [
            pl.BlockSpec((None, C_in, tl), lambda n, j, co: (n, 0, j)),
            pl.BlockSpec((co_tile, C_in), lambda n, j, co: (co, 0), **wb_kwargs),
            pl.BlockSpec((co_tile, 1), lambda n, j, co: (co, 0), **wb_kwargs),
        ]
        out_specs = pl.BlockSpec((None, co_tile, tl), lambda n, j, co: (n, co, j))
        out_shape = jax.ShapeDtypeStruct((N, C_out, HW), dtype)
        semantics = ("parallel", "parallel", "parallel")
    else:
        grid = (num_lane, num_co)
        in_specs = [
            pl.BlockSpec((C_in, tl), lambda j, co: (0, j)),
            pl.BlockSpec((co_tile, C_in), lambda j, co: (co, 0), **wb_kwargs),
            pl.BlockSpec((co_tile, 1), lambda j, co: (co, 0), **wb_kwargs),
        ]
        out_specs = pl.BlockSpec((co_tile, tl), lambda j, co: (co, j))
        out_shape = jax.ShapeDtypeStruct((C_out, lane_len), dtype)
        semantics = ("parallel", "parallel")

    out = pl.pallas_call(
        _fused_conv1x1_bn_relu_kernel,
        out_shape=out_shape,
        grid_spec=pltpu.PrefetchScalarGridSpec(
            num_scalar_prefetch=0, grid=grid,
            in_specs=in_specs, out_specs=out_specs),
        compiler_params=pltpu.CompilerParams(
            dimension_semantics=semantics,
            vmem_limit_bytes=vmem_limit),
        cost_estimate=cost,
    )(x_op, w, b2)

    if per_batch:
        return out.reshape(N, C_out, H, W)
    if lane_len != N * HW:
        out = out[:, :N * HW]                    # drop the (tiny) lane padding
    return out.reshape(C_out, N, HW).transpose(1, 0, 2).reshape(N, C_out, H, W)


# ---------------------------------------------------------------------------
# All four predictors (nn.Linear) in ONE pallas_call (128-lane-padded class axis)
# ---------------------------------------------------------------------------
def _fused_linear_kernel(x_ref, w_ref, b_ref, o_ref):
    acc = jnp.dot(x_ref[...], w_ref[...], preferred_element_type=jnp.float32)
    o_ref[...] = (acc + b_ref[...]).astype(o_ref.dtype)


def fused_predictors(feats_list, params_list):
    """feats_list: list of (B, F); params_list: list of (w (F, C_h), b (C_h,)).
    Returns a list of per-head logits (B, C_h)."""
    nheads = len(feats_list)
    B, F = feats_list[0].shape
    dtype = feats_list[0].dtype
    cpad = pl.cdiv(max(w.shape[1] for w, _ in params_list), 128) * 128

    x_stack = jnp.stack(feats_list, axis=0)                      # (H, B, F)
    w_stack = jnp.zeros((nheads, F, cpad), dtype)
    b_stack = jnp.zeros((nheads, 1, cpad), jnp.float32)
    for h, (w, b) in enumerate(params_list):
        c = w.shape[1]
        w_stack = w_stack.at[h, :, :c].set(w.astype(dtype))
        b_stack = b_stack.at[h, 0, :c].set(b.astype(jnp.float32))

    out = pl.pallas_call(
        _fused_linear_kernel,
        out_shape=jax.ShapeDtypeStruct((nheads, B, cpad), dtype),
        grid_spec=pltpu.PrefetchScalarGridSpec(
            num_scalar_prefetch=0,
            grid=(nheads,),
            in_specs=[
                pl.BlockSpec((None, B, F), lambda h: (h, 0, 0)),
                pl.BlockSpec((None, F, cpad), lambda h: (h, 0, 0)),
                pl.BlockSpec((None, 1, cpad), lambda h: (h, 0, 0)),
            ],
            out_specs=pl.BlockSpec((None, B, cpad), lambda h: (h, 0, 0)),
        ),
        compiler_params=pltpu.CompilerParams(dimension_semantics=("parallel",)),
    )(x_stack, w_stack, b_stack)

    return [out[h, :, :w.shape[1]] for h, (w, _) in enumerate(params_list)]


# ---------------------------------------------------------------------------
# Parameter init matching the PyTorch module
# ---------------------------------------------------------------------------
def init_bottleneck_params(key, in_dim, out_dim, eps=1e-5):
    """Conv2d(1x1) xavier_uniform weight + zero bias; BN gamma=1/beta=0; eval-mode fold."""
    limit = math.sqrt(6.0 / (in_dim + out_dim))                  # kernel_size=1
    w = jax.random.uniform(key, (out_dim, in_dim), jnp.float32, -limit, limit)
    b = jnp.zeros((out_dim,), jnp.float32)
    gamma = jnp.ones((out_dim,), jnp.float32)
    beta = jnp.zeros((out_dim,), jnp.float32)
    running_mean = jnp.zeros((out_dim,), jnp.float32)
    running_var = jnp.ones((out_dim,), jnp.float32)
    s = gamma / jnp.sqrt(running_var + eps)
    w_folded = w * s[:, None]                                    # (C_out, C_in)
    b_folded = (b - running_mean) * s + beta                     # (C_out,)
    return w_folded, b_folded


def init_predictor_params(key, feat_len, cate_num):
    """nn.Linear: weight ~ N(0, 0.01), bias = 0. Stored as (feat_len, cate_num)."""
    w = 0.01 * jax.random.normal(key, (feat_len, cate_num), jnp.float32)
    b = jnp.zeros((cate_num,), jnp.float32)
    return w, b


# ---------------------------------------------------------------------------
# CFDG forward, post-backbone path (cfdg=True, b_bkb_c=False, model_type='para_conv').
# The ResNet backbones are external constructor args (not translatable here); the kernel
# consumes the backbone feature map `feat_f_use` directly.
# ---------------------------------------------------------------------------
def cfdg_forward(feat_f_use, btnk_params, clf_params, feat_caus, single_buffer_w=True):
    feat_dim = btnk_params["c3"][0].shape[0]
    head_order = ("c3", "c2", "c1", "f0")

    # One fused conv+BN+ReLU over all four heads -> x read from HBM once.
    w_fused = jnp.concatenate([btnk_params[k][0] for k in head_order], axis=0)
    b_fused = jnp.concatenate([btnk_params[k][1] for k in head_order], axis=0)
    fused = fused_bottleneck_conv1(feat_f_use, w_fused, b_fused,
                                   single_buffer_weights=single_buffer_w)

    c3 = fused[:, 0 * feat_dim:1 * feat_dim]
    c2 = fused[:, 1 * feat_dim:2 * feat_dim]
    c1 = fused[:, 2 * feat_dim:3 * feat_dim]
    f0 = fused[:, 3 * feat_dim:4 * feat_dim]
    out_feat_btnk = [feat_f_use, c3, c2, c1, f0]

    # AdaptiveAvgPool2d((1,1)) for all heads in a single reduction over the fused tensor.
    pooled = jnp.mean(fused, axis=(2, 3))                        # (N, 4*feat_dim)

    def causal(h):                                               # causal channel slice, pooled
        return pooled[:, h * feat_dim: h * feat_dim + feat_caus]

    c3_p, c2_p, c1_p, f0_p = causal(0), causal(1), causal(2), causal(3)

    logits = fused_predictors(
        [c1_p, c2_p, c3_p, f0_p],
        [clf_params["c1"], clf_params["c2"], clf_params["c3"], clf_params["f0"]])
    logits_coarse = logits[:3]                                   # [c1, c2, c3] as in torch
    logits_f = logits[3]
    _logits_fine_soft = jax.nn.softmax(logits_f, axis=1)         # computed (unused in return)

    out_feat_btnk = [t.reshape(t.shape[0], t.shape[1], -1) for t in out_feat_btnk]
    return logits_f, logits_coarse, None, out_feat_btnk, None, None, None


# ---------------------------------------------------------------------------
if __name__ == "__main__":
    key = jax.random.PRNGKey(0)
    keys = jax.random.split(key, 10)

    # Small stand-in shapes (real model: feat_len=2048, feat_dim=args.feat_dim, 7x7 maps).
    B, in_dim, H, W = 2, 4, 16, 16
    feat_dim = 8
    feat_caus = feat_dim
    cate_num_all = {0: 10, 1: 6, 2: 4, 3: 3}     # fine, c1, c2, c3 class counts

    btnk_params = {
        "c3": init_bottleneck_params(keys[0], in_dim, feat_dim),
        "c2": init_bottleneck_params(keys[1], in_dim, feat_dim),
        "c1": init_bottleneck_params(keys[2], in_dim, feat_dim),
        "f0": init_bottleneck_params(keys[3], in_dim, feat_dim),
    }
    clf_params = {
        "f0": init_predictor_params(keys[4], feat_caus, cate_num_all[0]),
        "c1": init_predictor_params(keys[5], feat_caus, cate_num_all[1]),
        "c2": init_predictor_params(keys[6], feat_caus, cate_num_all[2]),
        "c3": init_predictor_params(keys[7], feat_caus, cate_num_all[3]),
    }

    x = jax.random.normal(keys[8], (B, in_dim, H, W), jnp.float32)   # backbone feature map

    fwd = jax.jit(cfdg_forward, static_argnums=(3, 4))
    try:  # prefer single-buffered grid-invariant weights; fall back if this build rejects it
        outs = fwd(x, btnk_params, clf_params, feat_caus, True)
        jax.block_until_ready(outs[0])
        sb_flag = True
    except Exception:
        outs = fwd(x, btnk_params, clf_params, feat_caus, False)
        jax.block_until_ready(outs[0])
        sb_flag = False
    logits_f, logits_coarse, _, out_feat_btnk, _, _, _ = outs

    # ---- pure-JAX reference (HIGHEST precision so f32 comparisons are tight) ----
    hp = jax.lax.Precision.HIGHEST

    def ref_btnk(xx, w, b):
        y = jnp.einsum("nchw,oc->nohw", xx, w, precision=hp) + b[None, :, None, None]
        return jnp.maximum(y, 0.0)

    def ref_pool(t):
        return jnp.mean(t[:, :feat_caus], axis=(2, 3))

    def ref_linear(f, w, b):
        return jnp.einsum("bf,fc->bc", f, w, precision=hp) + b

    refs = {k: ref_btnk(x, *btnk_params[k]) for k in ("c3", "c2", "c1", "f0")}

    assert logits_f.shape == (B, cate_num_all[0])
    assert out_feat_btnk[0].shape == (B, in_dim, H * W)
    assert jnp.allclose(out_feat_btnk[1], refs["c3"].reshape(B, feat_dim, -1), atol=1e-4, rtol=1e-4)
    assert jnp.allclose(out_feat_btnk[4], refs["f0"].reshape(B, feat_dim, -1), atol=1e-4, rtol=1e-4)
    assert jnp.allclose(logits_f, ref_linear(ref_pool(refs["f0"]), *clf_params["f0"]),
                        atol=1e-4, rtol=1e-4)
    assert jnp.allclose(logits_coarse[0], ref_linear(ref_pool(refs["c1"]), *clf_params["c1"]),
                        atol=1e-4, rtol=1e-4)
    assert jnp.allclose(logits_coarse[2], ref_linear(ref_pool(refs["c3"]), *clf_params["c3"]),
                        atol=1e-4, rtol=1e-4)

    # ---- small-map (7x7) case: exercises the lane-packed path (no per-image pad) ----
    x7 = jax.random.normal(keys[9], (B, in_dim, 7, 7), jnp.float32)
    outs7 = fwd(x7, btnk_params, clf_params, feat_caus, sb_flag)
    logits_f7 = jax.block_until_ready(outs7[0])
    ref7_f0 = ref_btnk(x7, *btnk_params["f0"])
    assert jnp.allclose(outs7[3][4], ref7_f0.reshape(B, feat_dim, -1), atol=1e-4, rtol=1e-4)
    assert jnp.allclose(logits_f7, ref_linear(ref_pool(ref7_f0), *clf_params["f0"]),
                        atol=1e-4, rtol=1e-4)

    # ---- bf16 compute-dtype deployment path (f32 accumulation, loose tolerance) ----
    head_order = ("c3", "c2", "c1", "f0")
    wf = jnp.concatenate([btnk_params[k][0] for k in head_order], axis=0)
    bf = jnp.concatenate([btnk_params[k][1] for k in head_order], axis=0)
    y16 = fused_bottleneck_conv1(x, wf, bf, compute_dtype=jnp.bfloat16,
                                 single_buffer_weights=sb_flag)
    y16 = jax.block_until_ready(y16)
    ref_full = jnp.concatenate([refs[k] for k in head_order], axis=1)
    assert jnp.allclose(y16.astype(jnp.float32), ref_full, atol=0.1, rtol=0.1)

    print("KERNEL_OK")
</pallas_src>

<mosaic_0001>
module attributes {stable_mosaic.version = 11 : i64} {
  func.func @_fused_conv1x1_bn_relu_kernel(%arg0: i32, %arg1: i32, %arg2: i32, %arg3: memref<1x4x256xf32, #tpu.memory_space<vmem>>, %arg4: memref<32x4xf32, #tpu.memory_space<vmem>>, %arg5: memref<32x1xf32, #tpu.memory_space<vmem>>, %arg6: memref<1x32x256xf32, #tpu.memory_space<vmem>>) attributes {dimension_semantics = [#tpu.dimension_semantics<parallel>, #tpu.dimension_semantics<parallel>, #tpu.dimension_semantics<parallel>], iteration_bounds = array<i64: 2, 1, 1>, scalar_prefetch = 0 : i64, scratch_operands = 0 : i64, tpu.core_type = #tpu.core_type<tc>, window_params = [{transform_indices = @transform_0, window_bounds = array<i64: 1, 4, 256>}, {pipeline_mode = #tpu.pipeline_mode<synchronous>, transform_indices = @transform_1, window_bounds = array<i64: 32, 4>}, {pipeline_mode = #tpu.pipeline_mode<synchronous>, transform_indices = @transform_2, window_bounds = array<i64: 32, 1>}, {transform_indices = @transform_3, window_bounds = array<i64: 1, 32, 256>}]} {
    %c0 = arith.constant 0 : index
    %c0_0 = arith.constant 0 : index
    %0 = vector.load %arg4[%c0, %c0_0] : memref<32x4xf32, #tpu.memory_space<vmem>>, vector<32x4xf32>
    %c0_1 = arith.constant 0 : index
    %c0_2 = arith.constant 0 : index
    %c0_3 = arith.constant 0 : index
    %1 = vector.load %arg3[%c0_1, %c0_2, %c0_3] : memref<1x4x256xf32, #tpu.memory_space<vmem>>, vector<1x4x256xf32>
    %2 = vector.shape_cast %1 : vector<1x4x256xf32> to vector<4x256xf32>
    %cst = arith.constant dense<0.000000e+00> : vector<32x256xf32>
    %3 = tpu.matmul %0, %2, %cst {dimension_numbers = #tpu.dot_dimension_numbers<[1], [0], [0], [1], [0, 0, 1, 1], [], []>} : vector<32x4xf32>, vector<4x256xf32>, vector<32x256xf32> -> vector<32x256xf32>
    %c0_4 = arith.constant 0 : index
    %c0_5 = arith.constant 0 : index
    %4 = vector.load %arg5[%c0_4, %c0_5] : memref<32x1xf32, #tpu.memory_space<vmem>>, vector<32x1xf32>
    %5 = vector.broadcast %4 : vector<32x1xf32> to vector<32x256xf32>
    %6 = arith.addf %3, %5 : vector<32x256xf32>
    %cst_6 = arith.constant 0.000000e+00 : f32
    %7 = vector.broadcast %cst_6 : f32 to vector<32x256xf32>
    %8 = arith.maximumf %6, %7 : vector<32x256xf32>
    %c0_7 = arith.constant 0 : index
    %c0_8 = arith.constant 0 : index
    %c0_9 = arith.constant 0 : index
    %9 = vector.load %arg6[%c0_7, %c0_8, %c0_9] : memref<1x32x256xf32, #tpu.memory_space<vmem>>, vector<1x32x256xf32>
    %10 = vector.shape_cast %9 : vector<1x32x256xf32> to vector<32x256xf32>
    %11 = vector.shape_cast %8 : vector<32x256xf32> to vector<1x32x256xf32>
    tpu.vector_store %arg6[%c0_7, %c0_8, %c0_9], %11 {strides = array<i32>} : memref<1x32x256xf32, #tpu.memory_space<vmem>>, vector<1x32x256xf32>,
    return
  }
  func.func @transform_0(%arg0: i32, %arg1: i32, %arg2: i32) -> (i32, i32, i32) {
    %c0_i32 = arith.constant 0 : i32
    %c0_i32_0 = arith.constant 0 : i32
    return %arg0, %c0_i32, %arg1 : i32, i32, i32
  }
  func.func @transform_1(%arg0: i32, %arg1: i32, %arg2: i32) -> (i32, i32) {
    %c0_i32 = arith.constant 0 : i32
    %c0_i32_0 = arith.constant 0 : i32
    return %arg2, %c0_i32 : i32, i32
  }
  func.func @transform_2(%arg0: i32, %arg1: i32, %arg2: i32) -> (i32, i32) {
    %c0_i32 = arith.constant 0 : i32
    %c0_i32_0 = arith.constant 0 : i32
    return %arg2, %c0_i32 : i32, i32
  }
  func.func @transform_3(%arg0: i32, %arg1: i32, %arg2: i32) -> (i32, i32, i32) {
    %c0_i32 = arith.constant 0 : i32
    return %arg0, %arg2, %arg1 : i32, i32, i32
  }
}

module attributes {stable_mosaic.version = 11 : i64} {
  func.func @_fused_linear_kernel(%arg0: i32, %arg1: memref<1x2x8xf32, #tpu.memory_space<vmem>>, %arg2: memref<1x8x128xf32, #tpu.memory_space<vmem>>, %arg3: memref<1x1x128xf32, #tpu.memory_space<vmem>>, %arg4: memref<1x2x128xf32, #tpu.memory_space<vmem>>) attributes {dimension_semantics = [#tpu.dimension_semantics<parallel>], iteration_bounds = array<i64: 4>, scalar_prefetch = 0 : i64, scratch_operands = 0 : i64, tpu.core_type = #tpu.core_type<tc>, window_params = [{transform_indices = @transform_0, window_bounds = array<i64: 1, 2, 8>}, {transform_indices = @transform_1, window_bounds = array<i64: 1, 8, 128>}, {transform_indices = @transform_2, window_bounds = array<i64: 1, 1, 128>}, {transform_indices = @transform_3, window_bounds = array<i64: 1, 2, 128>}]} {
    %c0 = arith.constant 0 : index
    %c0_0 = arith.constant 0 : index
    %c0_1 = arith.constant 0 : index
    %0 = vector.load %arg1[%c0, %c0_0, %c0_1] : memref<1x2x8xf32, #tpu.memory_space<vmem>>, vector<1x2x8xf32>
    %1 = vector.shape_cast %0 : vector<1x2x8xf32> to vector<2x8xf32>
    %c0_2 = arith.constant 0 : index
    %c0_3 = arith.constant 0 : index
    %c0_4 = arith.constant 0 : index
    %2 = vector.load %arg2[%c0_2, %c0_3, %c0_4] : memref<1x8x128xf32, #tpu.memory_space<vmem>>, vector<1x8x128xf32>
    %3 = vector.shape_cast %2 : vector<1x8x128xf32> to vector<8x128xf32>
    %cst = arith.constant dense<0.000000e+00> : vector<2x128xf32>
    %4 = tpu.matmul %1, %3, %cst {dimension_numbers = #tpu.dot_dimension_numbers<[1], [0], [0], [1], [0, 0, 1, 1], [], []>} : vector<2x8xf32>, vector<8x128xf32>, vector<2x128xf32> -> vector<2x128xf32>
    %c0_5 = arith.constant 0 : index
    %c0_6 = arith.constant 0 : index
    %c0_7 = arith.constant 0 : index
    %5 = vector.load %arg3[%c0_5, %c0_6, %c0_7] : memref<1x1x128xf32, #tpu.memory_space<vmem>>, vector<1x1x128xf32>
    %6 = vector.shape_cast %5 : vector<1x1x128xf32> to vector<1x128xf32>
    %7 = vector.broadcast %6 : vector<1x128xf32> to vector<2x128xf32>
    %8 = arith.addf %4, %7 : vector<2x128xf32>
    %c0_8 = arith.constant 0 : index
    %c0_9 = arith.constant 0 : index
    %c0_10 = arith.constant 0 : index
    %9 = vector.load %arg4[%c0_8, %c0_9, %c0_10] : memref<1x2x128xf32, #tpu.memory_space<vmem>>, vector<1x2x128xf32>
    %10 = vector.shape_cast %9 : vector<1x2x128xf32> to vector<2x128xf32>
    %11 = vector.shape_cast %8 : vector<2x128xf32> to vector<1x2x128xf32>
    tpu.vector_store %arg4[%c0_8, %c0_9, %c0_10], %11 {strides = array<i32>} : memref<1x2x128xf32, #tpu.memory_space<vmem>>, vector<1x2x128xf32>,
    return
  }
  func.func @transform_0(%arg0: i32) -> (i32, i32, i32) {
    %c0_i32 = arith.constant 0 : i32
    %c0_i32_0 = arith.constant 0 : i32
    %c0_i32_1 = arith.constant 0 : i32
    return %arg0, %c0_i32, %c0_i32_0 : i32, i32, i32
  }
  func.func @transform_1(%arg0: i32) -> (i32, i32, i32) {
    %c0_i32 = arith.constant 0 : i32
    %c0_i32_0 = arith.constant 0 : i32
    %c0_i32_1 = arith.constant 0 : i32
    return %arg0, %c0_i32, %c0_i32_0 : i32, i32, i32
  }
  func.func @transform_2(%arg0: i32) -> (i32, i32, i32) {
    %c0_i32 = arith.constant 0 : i32
    %c0_i32_0 = arith.constant 0 : i32
    %c0_i32_1 = arith.constant 0 : i32
    return %arg0, %c0_i32, %c0_i32_0 : i32, i32, i32
  }
  func.func @transform_3(%arg0: i32) -> (i32, i32, i32) {
    %c0_i32 = arith.constant 0 : i32
    %c0_i32_0 = arith.constant 0 : i32
    %c0_i32_1 = arith.constant 0 : i32
    return %arg0, %c0_i32, %c0_i32_0 : i32, i32, i32
  }
}

module attributes {stable_mosaic.version = 11 : i64} {
  func.func @_fused_conv1x1_bn_relu_kernel(%arg0: i32, %arg1: i32, %arg2: i32, %arg3: memref<1x4x256xf32, #tpu.memory_space<vmem>>, %arg4: memref<32x4xf32, #tpu.memory_space<vmem>>, %arg5: memref<32x1xf32, #tpu.memory_space<vmem>>, %arg6: memref<1x32x256xf32, #tpu.memory_space<vmem>>) attributes {dimension_semantics = [#tpu.dimension_semantics<parallel>, #tpu.dimension_semantics<parallel>, #tpu.dimension_semantics<parallel>], iteration_bounds = array<i64: 2, 1, 1>, scalar_prefetch = 0 : i64, scratch_operands = 0 : i64, tpu.core_type = #tpu.core_type<tc>, window_params = [{transform_indices = @transform_0, window_bounds = array<i64: 1, 4, 256>}, {transform_indices = @transform_1, window_bounds = array<i64: 32, 4>}, {transform_indices = @transform_2, window_bounds = array<i64: 32, 1>}, {transform_indices = @transform_3, window_bounds = array<i64: 1, 32, 256>}]} {
    %c0 = arith.constant 0 : index
    %c0_0 = arith.constant 0 : index
    %0 = vector.load %arg4[%c0, %c0_0] : memref<32x4xf32, #tpu.memory_space<vmem>>, vector<32x4xf32>
    %c0_1 = arith.constant 0 : index
    %c0_2 = arith.constant 0 : index
    %c0_3 = arith.constant 0 : index
    %1 = vector.load %arg3[%c0_1, %c0_2, %c0_3] : memref<1x4x256xf32, #tpu.memory_space<vmem>>, vector<1x4x256xf32>
    %2 = vector.shape_cast %1 : vector<1x4x256xf32> to vector<4x256xf32>
    %cst = arith.constant dense<0.000000e+00> : vector<32x256xf32>
    %3 = tpu.matmul %0, %2, %cst {dimension_numbers = #tpu.dot_dimension_numbers<[1], [0], [0], [1], [0, 0, 1, 1], [], []>} : vector<32x4xf32>, vector<4x256xf32>, vector<32x256xf32> -> vector<32x256xf32>
    %c0_4 = arith.constant 0 : index
    %c0_5 = arith.constant 0 : index
    %4 = vector.load %arg5[%c0_4, %c0_5] : memref<32x1xf32, #tpu.memory_space<vmem>>, vector<32x1xf32>
    %5 = vector.broadcast %4 : vector<32x1xf32> to vector<32x256xf32>
    %6 = arith.addf %3, %5 : vector<32x256xf32>
    %cst_6 = arith.constant 0.000000e+00 : f32
    %7 = vector.broadcast %cst_6 : f32 to vector<32x256xf32>
    %8 = arith.maximumf %6, %7 : vector<32x256xf32>
    %c0_7 = arith.constant 0 : index
    %c0_8 = arith.constant 0 : index
    %c0_9 = arith.constant 0 : index
    %9 = vector.load %arg6[%c0_7, %c0_8, %c0_9] : memref<1x32x256xf32, #tpu.memory_space<vmem>>, vector<1x32x256xf32>
    %10 = vector.shape_cast %9 : vector<1x32x256xf32> to vector<32x256xf32>
    %11 = vector.shape_cast %8 : vector<32x256xf32> to vector<1x32x256xf32>
    tpu.vector_store %arg6[%c0_7, %c0_8, %c0_9], %11 {strides = array<i32>} : memref<1x32x256xf32, #tpu.memory_space<vmem>>, vector<1x32x256xf32>,
    return
  }
  func.func @transform_0(%arg0: i32, %arg1: i32, %arg2: i32) -> (i32, i32, i32) {
    %c0_i32 = arith.constant 0 : i32
    %c0_i32_0 = arith.constant 0 : i32
    return %arg0, %c0_i32, %arg1 : i32, i32, i32
  }
  func.func @transform_1(%arg0: i32, %arg1: i32, %arg2: i32) -> (i32, i32) {
    %c0_i32 = arith.constant 0 : i32
    %c0_i32_0 = arith.constant 0 : i32
    return %arg2, %c0_i32 : i32, i32
  }
  func.func @transform_2(%arg0: i32, %arg1: i32, %arg2: i32) -> (i32, i32) {
    %c0_i32 = arith.constant 0 : i32
    %c0_i32_0 = arith.constant 0 : i32
    return %arg2, %c0_i32 : i32, i32
  }
  func.func @transform_3(%arg0: i32, %arg1: i32, %arg2: i32) -> (i32, i32, i32) {
    %c0_i32 = arith.constant 0 : i32
    return %arg0, %arg2, %arg1 : i32, i32, i32
  }
}

module attributes {stable_mosaic.version = 11 : i64} {
  func.func @_fused_linear_kernel(%arg0: i32, %arg1: memref<1x2x8xf32, #tpu.memory_space<vmem>>, %arg2: memref<1x8x128xf32, #tpu.memory_space<vmem>>, %arg3: memref<1x1x128xf32, #tpu.memory_space<vmem>>, %arg4: memref<1x2x128xf32, #tpu.memory_space<vmem>>) attributes {dimension_semantics = [#tpu.dimension_semantics<parallel>], iteration_bounds = array<i64: 4>, scalar_prefetch = 0 : i64, scratch_operands = 0 : i64, tpu.core_type = #tpu.core_type<tc>, window_params = [{transform_indices = @transform_0, window_bounds = array<i64: 1, 2, 8>}, {transform_indices = @transform_1, window_bounds = array<i64: 1, 8, 128>}, {transform_indices = @transform_2, window_bounds = array<i64: 1, 1, 128>}, {transform_indices = @transform_3, window_bounds = array<i64: 1, 2, 128>}]} {
    %c0 = arith.constant 0 : index
    %c0_0 = arith.constant 0 : index
    %c0_1 = arith.constant 0 : index
    %0 = vector.load %arg1[%c0, %c0_0, %c0_1] : memref<1x2x8xf32, #tpu.memory_space<vmem>>, vector<1x2x8xf32>
    %1 = vector.shape_cast %0 : vector<1x2x8xf32> to vector<2x8xf32>
    %c0_2 = arith.constant 0 : index
    %c0_3 = arith.constant 0 : index
    %c0_4 = arith.constant 0 : index
    %2 = vector.load %arg2[%c0_2, %c0_3, %c0_4] : memref<1x8x128xf32, #tpu.memory_space<vmem>>, vector<1x8x128xf32>
    %3 = vector.shape_cast %2 : vector<1x8x128xf32> to vector<8x128xf32>
    %cst = arith.constant dense<0.000000e+00> : vector<2x128xf32>
    %4 = tpu.matmul %1, %3, %cst {dimension_numbers = #tpu.dot_dimension_numbers<[1], [0], [0], [1], [0, 0, 1, 1], [], []>} : vector<2x8xf32>, vector<8x128xf32>, vector<2x128xf32> -> vector<2x128xf32>
    %c0_5 = arith.constant 0 : index
    %c0_6 = arith.constant 0 : index
    %c0_7 = arith.constant 0 : index
    %5 = vector.load %arg3[%c0_5, %c0_6, %c0_7] : memref<1x1x128xf32, #tpu.memory_space<vmem>>, vector<1x1x128xf32>
    %6 = vector.shape_cast %5 : vector<1x1x128xf32> to vector<1x128xf32>
    %7 = vector.broadcast %6 : vector<1x128xf32> to vector<2x128xf32>
    %8 = arith.addf %4, %7 : vector<2x128xf32>
    %c0_8 = arith.constant 0 : index
    %c0_9 = arith.constant 0 : index
    %c0_10 = arith.constant 0 : index
    %9 = vector.load %arg4[%c0_8, %c0_9, %c0_10] : memref<1x2x128xf32, #tpu.memory_space<vmem>>, vector<1x2x128xf32>
    %10 = vector.shape_cast %9 : vector<1x2x128xf32> to vector<2x128xf32>
    %11 = vector.shape_cast %8 : vector<2x128xf32> to vector<1x2x128xf32>
    tpu.vector_store %arg4[%c0_8, %c0_9, %c0_10], %11 {strides = array<i32>} : memref<1x2x128xf32, #tpu.memory_space<vmem>>, vector<1x2x128xf32>,
    return
  }
  func.func @transform_0(%arg0: i32) -> (i32, i32, i32) {
    %c0_i32 = arith.constant 0 : i32
    %c0_i32_0 = arith.constant 0 : i32
    %c0_i32_1 = arith.constant 0 : i32
    return %arg0, %c0_i32, %c0_i32_0 : i32, i32, i32
  }
  func.func @transform_1(%arg0: i32) -> (i32, i32, i32) {
    %c0_i32 = arith.constant 0 : i32
    %c0_i32_0 = arith.constant 0 : i32
    %c0_i32_1 = arith.constant 0 : i32
    return %arg0, %c0_i32, %c0_i32_0 : i32, i32, i32
  }
  func.func @transform_2(%arg0: i32) -> (i32, i32, i32) {
    %c0_i32 = arith.constant 0 : i32
    %c0_i32_0 = arith.constant 0 : i32
    %c0_i32_1 = arith.constant 0 : i32
    return %arg0, %c0_i32, %c0_i32_0 : i32, i32, i32
  }
  func.func @transform_3(%arg0: i32) -> (i32, i32, i32) {
    %c0_i32 = arith.constant 0 : i32
    %c0_i32_0 = arith.constant 0 : i32
    %c0_i32_1 = arith.constant 0 : i32
    return %arg0, %c0_i32, %c0_i32_0 : i32, i32, i32
  }
}

</mosaic_0001>

<bundles_post_ra>
// kernel: cfdg_forward.2
= control target key start
LH: loop header
LB: loop body
LE: loop exit
PB: predicated region body
PF: predicated region fallthrough
CT: control target
= control target key end

     0   :  { %s637_s12 = smov 0   ;;  %s639_s13 = smov 0   ;;  %s716_s0 = inlined_call_operand.vmem [shape: f32[2,4,256], index: 0, kind: input, shape index: {}]   ;;  %s717_s1 = inlined_call_operand.vmem [shape: f32[32,4], index: 1, kind: input, shape index: {}]   ;;  %s718_s2 = inlined_call_operand.vmem [shape: f32[32,1], index: 2, kind: input, shape index: {}]   ;;  %s719_s3 = inlined_call_operand.vmem [shape: f32[2,32,256], index: 3, kind: output, shape index: {}]  }
   0x1   :  { %s641_s14 = smov 0  }
   0x2 LB: > { %s32_s15 = sadd.s32 1, %s610_s13  ;;  %p544_p0 = scmp.ge.s32.totalorder %s614_s14, 1  ;;  %s614_s14 = sphi %s641_s14, %s13_s14   ;;  %s610_s13 = sphi %s639_s13, %s721_s13   ;;  %s606_s12 = sphi %s637_s12, %s720_s12  }
   0x3   : > { %p34_p1 = scmp.ge.s32.totalorder %s32_s15, 2  ;;  %p189_p2 = scmp.lt.s32.totalorder %s614_s14, 3 }
   0x5   : > { %s723_s15 = smov (%p34_p1, %s32_s15), 0  ;;  %p190_p3 = pnand %p544_p0, %p189_p2 }
   0x6   : > { %p237_p4 = scmp.lt.s32.totalorder (!%p190_p3), %s606_s12, 1 }
   0x7   : > { %193 = sbr.rel (%p190_p3) target bundleno = 172 (0xac), region = 32 }
   0xc   : > { %v616_v0 = vmov 0   ;;  %v281_v1 = vld [vmem:[%s718_s2 + $0x10] sm:$0xff]  ;;  %s725_s12 = smov (!%p237_p4, %s606_s12), 1  ;;  %v279_v2 = vld [vmem:[%s718_s2] sm:$0xff]  ;;  %v282_v4 = vld [vmem:[%s718_s2 + $0x18] sm:$0xff]  ;;  %vm320_vm0 = vcmask 1043456  }
   0xd   : > { %591 = vset.pattern.permute.xlu1 %v616_v0  ;;  %590 = vset.pattern.permute.xlu0 %v616_v0  ;;  %s561_s20 = sshll.u32 %s725_s12, 3  ;;  %v280_v5 = vld [vmem:[%s718_s2 + $0x8] sm:$0xff]  ;;  %v274_v6 = vld [vmem:[%s717_s1] sm:$0xff]  ;;  %vm307_vm1 = vcmask 31744   ;;  %v276_v7 = vld [vmem:[%s717_s1 + $0x10] sm:$0xff]  ;;  %s562_s9 = sshll.u32 %s725_s12, 6 }
   0xe   : > { %295 = vperm.xlu1 %591, %v281_v1   ;;  %285 = vperm.xlu0 %590, %v279_v2   ;;  %s244_s23 = scalar_lea.vmem %s716_s0, %s561_s20  ;;  %v275_v10 = vld [vmem:[%s717_s1 + $0x8] sm:$0xff]  ;;  %v277_v11 = vld [vmem:[%s717_s1 + $0x18] sm:$0xff]  ;;  %s697_s16 = scalar_lea.vmem %s719_s3, %s562_s9 }
   0xf   : > { %v278_v3 = vld [vmem:[%s244_s23] sm:$0xff] }
  0x10   : > { %304 = vst [vmem:[#allocation1] ss:$2 sm:$0xff] %v278_v3 }
  0x16   : > { %300 = vperm.xlu1 %591, %v282_v4   ;;  %290 = vperm.xlu0 %590, %v280_v5  }
  0x17   : > { %v305_v8 = vld.sshfl [vmem:[#allocation1] sm:$0xff pattern:$0x75316420]  ;;  %v306_v9 = vld.sshfl [vmem:[#allocation1 + $0x8] sm:$0xff pattern:$0x75316420] }
  0x18   : > { %549 = vmatpush.msk.msra.mxu0 %vm320_vm0, %v305_v8  ;;  %563 = vmatpush.msk.msra.mxu2 %vm320_vm0, %v305_v8 }
  0x19   : > { %554 = vmatpush.msk.msra.mxu1 %vm320_vm0, %v306_v9  ;;  %564 = vmatpush.msk.msra.mxu3 %vm320_vm0, %v306_v9 }
  0x1a   : > { %550 = vmatmul.msk.f32.vlgmr.msra.gmra.mxu0 %vm307_vm1, %v274_v6  ;;  %552 = vmatmul.msk.f32.vlgmr.msra.gmra.mxu2 %vm307_vm1, %v276_v7 }
  0x1b   : > { %555 = vmatmul.msk.f32.vlgmr.msra.gmra.mxu1 %vm307_vm1, %v274_v6  ;;  %557 = vmatmul.msk.f32.vlgmr.msra.gmra.mxu3 %vm307_vm1, %v276_v7 }
  0x22   : > { %551 = vmatmul.msk.f32.gmra.mxu0 %vm307_vm1, %v275_v10  ;;  %553 = vmatmul.msk.f32.gmra.mxu2 %vm307_vm1, %v277_v11 }
  0x23   : > { %556 = vmatmul.msk.f32.gmra.mxu1 %vm307_vm1, %v275_v10  ;;  %558 = vmatmul.msk.f32.gmra.mxu3 %vm307_vm1, %v277_v11 }
  0x80   : > { %v286_v12 = vpop.permute.xlu0 %285  ;;  %v296_v18 = vpop.permute.xlu1 %295 }
  0x88   : > { %v291_v23 = vpop.permute.xlu0 %290  ;;  %v301_v33 = vpop.permute.xlu1 %300 }
  0x97   : > { %v342_v13 = vpop.f32.mrf.mxu0 }
  0x98   : > { %v343_v14 = vadd.f32 %v342_v13, %v286_v12  ;;  %v371_v15 = vpop.f32.mrf.mxu1 }
  0x99   : > { %v372_v16 = vadd.f32 %v371_v15, %v286_v12 }
  0x9a   : > { %v383_v17 = vmax.f32 %v343_v14, 0.0 }
  0x9b   : > { %v384_v19 = vmax.f32 %v372_v16, 0.0 }
  0x9c   : > { %391 = vst [vmem:[%s697_s16] sm:$0xff] %v383_v17 }
  0x9d   : > { %392 = vst [vmem:[%s697_s16 + $0x8] sm:$0xff] %v384_v19  ;;  %v348_v20 = vpop.f32.mrf.mxu2 }
  0x9e   : > { %v349_v21 = vadd.f32 %v348_v20, %v296_v18  ;;  %v377_v22 = vpop.f32.mrf.mxu3 }
  0x9f   : > { %v378_v24 = vadd.f32 %v377_v22, %v296_v18  ;;  %v345_v25 = vpop.f32.mrf.mxu0 }
  0xa0   : > { %v387_v26 = vmax.f32 %v349_v21, 0.0  ;;  %v346_v27 = vadd.f32 %v345_v25, %v291_v23  ;;  %v374_v28 = vpop.f32.mrf.mxu1 }
  0xa1   : > { %v388_v29 = vmax.f32 %v378_v24, 0.0  ;;  %v375_v30 = vadd.f32 %v374_v28, %v291_v23 }
  0xa2   : > { %395 = vst [vmem:[%s697_s16 + $0x20] sm:$0xff] %v387_v26  ;;  %v385_v31 = vmax.f32 %v346_v27, 0.0 }
  0xa3   : > { %396 = vst [vmem:[%s697_s16 + $0x28] sm:$0xff] %v388_v29  ;;  %v386_v32 = vmax.f32 %v375_v30, 0.0 }
  0xa4   : > { %393 = vst [vmem:[%s697_s16 + $0x10] sm:$0xff] %v385_v31 }
  0xa5   : > { %394 = vst [vmem:[%s697_s16 + $0x18] sm:$0xff] %v386_v32  ;;  %v351_v34 = vpop.f32.mrf.mxu2 }
  0xa6   : > { %v352_v35 = vadd.f32 %v351_v34, %v301_v33  ;;  %v380_v36 = vpop.f32.mrf.mxu3 }
  0xa7   : > { %v381_v37 = vadd.f32 %v380_v36, %v301_v33 }
  0xa8   : > { %v389_v38 = vmax.f32 %v352_v35, 0.0 }
  0xa9   : > { %v390_v39 = vmax.f32 %v381_v37, 0.0 }
  0xaa   : > { %397 = vst [vmem:[%s697_s16 + $0x30] sm:$0xff] %v389_v38 }
  0xab   : > { %398 = vst [vmem:[%s697_s16 + $0x38] sm:$0xff] %v390_v39 }
  0xac PF: > { %s13_s14 = sadd.s32 1, %s614_s14   ;;  %s720_s12 = smov %s610_s13 }
  0xad   : > { %p10_p5 = scmp.ge.s32.totalorder %s13_s14, 4   ;;  %s721_s13 = smov %s723_s15 }
  0xaf   :  { %12 = sbr.rel (!%p10_p5) target bundleno = 2 (0x2), region = 68 }

// kernel: cfdg_forward.3
= control target key start
LH: loop header
LB: loop body
LE: loop exit
PB: predicated region body
PF: predicated region fallthrough
CT: control target
= control target key end

     0   :  { %s350_s12 = smov 0   ;;  %s367_s0 = inlined_call_operand.vmem [shape: f32[4,2,8], index: 0, kind: input, shape index: {}]   ;;  %s368_s1 = inlined_call_operand.vmem [shape: f32[4,8,128], index: 1, kind: input, shape index: {}]   ;;  %s369_s2 = inlined_call_operand.vmem [shape: f32[4,1,128], index: 2, kind: input, shape index: {}]   ;;  %s370_s3 = inlined_call_operand.vmem [shape: f32[4,2,128], index: 3, kind: output, shape index: {}]  }
   0x1 LB: > { %s302_s13 = sadd.s32 4294967295, %s328_s12   ;;  %p306_p0 = scmp.ge.s32.totalorder %s328_s12, 1  ;;  %s328_s12 = sphi %s350_s12, %s13_s12  }
   0x2   : > { %p153_p1 = scmp.lt.s32.totalorder %s328_s12, 5 }
   0x4   : > { %p154_p2 = pnand %p306_p0, %p153_p1 }
   0x5   : > { %p182_p3 = scmp.lt.s32.totalorder (!%p154_p2), %s302_s13, 3 }
   0x6   : > { %157 = sbr.rel (%p154_p2) target bundleno = 145 (0x91), region = 32 }
   0xb   : > { %s372_s13 = smov (!%p182_p3, %s302_s13), 3  ;;  %vm203_vm0 = vcmask 64512  }
   0xc   : > { %s308_s14 = sshll.u32 %s372_s13, 3  ;;  %s307_s15 = sshll.u32 %s372_s13, 1 }
   0xd   : > { %s189_s18 = scalar_lea.vmem %s368_s1, %s308_s14  ;;  %s185_s21 = scalar_lea.vmem %s367_s0, %s307_s15 }
   0xe   : > { %v198_v0 = vld [vmem:[%s189_s18] sm:$0xff]  ;;  %s192_s24 = scalar_lea.vmem %s369_s2, %s372_s13  ;;  %s196_s27 = scalar_lea.vmem %s370_s3, %s307_s15 }
   0xf   : > { %v197_v1 = vld [vmem:[%s185_s21] sm:$0x3]  ;;  %222 = vmatpush.msra.mxu0 %v198_v0 }
  0x10   : > { %310 = vmatmul.msk.f32.vlgmr.msra.gmra.mxu0 %vm203_vm0, %v197_v1  ;;  %v321_v2 = vld [vmem:[%s192_s24] ss:$0 sm:$0xff] }
  0x8d   : > { %v224_v3 = vpop.f32.mrf.mxu0 }
  0x8e   : > { %v225_v4 = vadd.f32 %v321_v2, %v224_v3 }
  0x90   : > { %227 = vst [vmem:[%s196_s27] sm:$0x3] %v225_v4 }
  0x91 PF: > { %s13_s12 = sadd.s32 1, %s328_s12  }
  0x92   : > { %p10_p4 = scmp.ge.s32.totalorder %s13_s12, 6  }
  0x94   :  { %12 = sbr.rel (!%p10_p4) target bundleno = 1 (0x1), region = 68 }

// kernel: cfdg_forward.2
= control target key start
LH: loop header
LB: loop body
LE: loop exit
PB: predicated region body
PF: predicated region fallthrough
CT: control target
= control target key end

     0   :  { %s637_s12 = smov 0   ;;  %s639_s13 = smov 0   ;;  %s716_s0 = inlined_call_operand.vmem [shape: f32[2,4,256], index: 0, kind: input, shape index: {}]   ;;  %s717_s1 = inlined_call_operand.vmem [shape: f32[32,4], index: 1, kind: input, shape index: {}]   ;;  %s718_s2 = inlined_call_operand.vmem [shape: f32[32,1], index: 2, kind: input, shape index: {}]   ;;  %s719_s3 = inlined_call_operand.vmem [shape: f32[2,32,256], index: 3, kind: output, shape index: {}]  }
   0x1   :  { %s641_s14 = smov 0  }
   0x2 LB: > { %s32_s15 = sadd.s32 1, %s610_s13  ;;  %p544_p0 = scmp.ge.s32.totalorder %s614_s14, 1  ;;  %s614_s14 = sphi %s641_s14, %s13_s14   ;;  %s610_s13 = sphi %s639_s13, %s721_s13   ;;  %s606_s12 = sphi %s637_s12, %s720_s12  }
   0x3   : > { %p34_p1 = scmp.ge.s32.totalorder %s32_s15, 2  ;;  %p189_p2 = scmp.lt.s32.totalorder %s614_s14, 3 }
   0x5   : > { %s723_s15 = smov (%p34_p1, %s32_s15), 0  ;;  %p190_p3 = pnand %p544_p0, %p189_p2 }
   0x6   : > { %p237_p4 = scmp.lt.s32.totalorder (!%p190_p3), %s606_s12, 1 }
   0x7   : > { %193 = sbr.rel (%p190_p3) target bundleno = 172 (0xac), region = 32 }
   0xc   : > { %v616_v0 = vmov 0   ;;  %v281_v1 = vld [vmem:[%s718_s2 + $0x10] sm:$0xff]  ;;  %s725_s12 = smov (!%p237_p4, %s606_s12), 1  ;;  %v279_v2 = vld [vmem:[%s718_s2] sm:$0xff]  ;;  %v282_v4 = vld [vmem:[%s718_s2 + $0x18] sm:$0xff]  ;;  %vm320_vm0 = vcmask 1043456  }
   0xd   : > { %591 = vset.pattern.permute.xlu1 %v616_v0  ;;  %590 = vset.pattern.permute.xlu0 %v616_v0  ;;  %s561_s20 = sshll.u32 %s725_s12, 3  ;;  %v280_v5 = vld [vmem:[%s718_s2 + $0x8] sm:$0xff]  ;;  %v274_v6 = vld [vmem:[%s717_s1] sm:$0xff]  ;;  %vm307_vm1 = vcmask 31744   ;;  %v276_v7 = vld [vmem:[%s717_s1 + $0x10] sm:$0xff]  ;;  %s562_s9 = sshll.u32 %s725_s12, 6 }
   0xe   : > { %295 = vperm.xlu1 %591, %v281_v1   ;;  %285 = vperm.xlu0 %590, %v279_v2   ;;  %s244_s23 = scalar_lea.vmem %s716_s0, %s561_s20  ;;  %v275_v10 = vld [vmem:[%s717_s1 + $0x8] sm:$0xff]  ;;  %v277_v11 = vld [vmem:[%s717_s1 + $0x18] sm:$0xff]  ;;  %s697_s16 = scalar_lea.vmem %s719_s3, %s562_s9 }
   0xf   : > { %v278_v3 = vld [vmem:[%s244_s23] sm:$0xff] }
  0x10   : > { %304 = vst [vmem:[#allocation1] ss:$2 sm:$0xff] %v278_v3 }
  0x16   : > { %300 = vperm.xlu1 %591, %v282_v4   ;;  %290 = vperm.xlu0 %590, %v280_v5  }
  0x17   : > { %v305_v8 = vld.sshfl [vmem:[#allocation1] sm:$0xff pattern:$0x75316420]  ;;  %v306_v9 = vld.sshfl [vmem:[#allocation1 + $0x8] sm:$0xff pattern:$0x75316420] }
  0x18   : > { %549 = vmatpush.msk.msra.mxu0 %vm320_vm0, %v305_v8  ;;  %563 = vmatpush.msk.msra.mxu2 %vm320_vm0, %v305_v8 }
  0x19   : > { %554 = vmatpush.msk.msra.mxu1 %vm320_vm0, %v306_v9  ;;  %564 = vmatpush.msk.msra.mxu3 %vm320_vm0, %v306_v9 }
  0x1a   : > { %550 = vmatmul.msk.f32.vlgmr.msra.gmra.mxu0 %vm307_vm1, %v274_v6  ;;  %552 = vmatmul.msk.f32.vlgmr.msra.gmra.mxu2 %vm307_vm1, %v276_v7 }
  0x1b   : > { %555 = vmatmul.msk.f32.vlgmr.msra.gmra.mxu1 %vm307_vm1, %v274_v6  ;;  %557 = vmatmul.msk.f32.vlgmr.msra.gmra.mxu3 %vm307_vm1, %v276_v7 }
  0x22   : > { %551 = vmatmul.msk.f32.gmra.mxu0 %vm307_vm1, %v275_v10  ;;  %553 = vmatmul.msk.f32.gmra.mxu2 %vm307_vm1, %v277_v11 }
  0x23   : > { %556 = vmatmul.msk.f32.gmra.mxu1 %vm307_vm1, %v275_v10  ;;  %558 = vmatmul.msk.f32.gmra.mxu3 %vm307_vm1, %v277_v11 }
  0x80   : > { %v286_v12 = vpop.permute.xlu0 %285  ;;  %v296_v18 = vpop.permute.xlu1 %295 }
  0x88   : > { %v291_v23 = vpop.permute.xlu0 %290  ;;  %v301_v33 = vpop.permute.xlu1 %300 }
  0x97   : > { %v342_v13 = vpop.f32.mrf.mxu0 }
  0x98   : > { %v343_v14 = vadd.f32 %v342_v13, %v286_v12  ;;  %v371_v15 = vpop.f32.mrf.mxu1 }
  0x99   : > { %v372_v16 = vadd.f32 %v371_v15, %v286_v12 }
  0x9a   : > { %v383_v17 = vmax.f32 %v343_v14, 0.0 }
  0x9b   : > { %v384_v19 = vmax.f32 %v372_v16, 0.0 }
  0x9c   : > { %391 = vst [vmem:[%s697_s16] sm:$0xff] %v383_v17 }
  0x9d   : > { %392 = vst [vmem:[%s697_s16 + $0x8] sm:$0xff] %v384_v19  ;;  %v348_v20 = vpop.f32.mrf.mxu2 }
  0x9e   : > { %v349_v21 = vadd.f32 %v348_v20, %v296_v18  ;;  %v377_v22 = vpop.f32.mrf.mxu3 }
  0x9f   : > { %v378_v24 = vadd.f32 %v377_v22, %v296_v18  ;;  %v345_v25 = vpop.f32.mrf.mxu0 }
  0xa0   : > { %v387_v26 = vmax.f32 %v349_v21, 0.0  ;;  %v346_v27 = vadd.f32 %v345_v25, %v291_v23  ;;  %v374_v28 = vpop.f32.mrf.mxu1 }
  0xa1   : > { %v388_v29 = vmax.f32 %v378_v24, 0.0  ;;  %v375_v30 = vadd.f32 %v374_v28, %v291_v23 }
  0xa2   : > { %395 = vst [vmem:[%s697_s16 + $0x20] sm:$0xff] %v387_v26  ;;  %v385_v31 = vmax.f32 %v346_v27, 0.0 }
  0xa3   : > { %396 = vst [vmem:[%s697_s16 + $0x28] sm:$0xff] %v388_v29  ;;  %v386_v32 = vmax.f32 %v375_v30, 0.0 }
  0xa4   : > { %393 = vst [vmem:[%s697_s16 + $0x10] sm:$0xff] %v385_v31 }
  0xa5   : > { %394 = vst [vmem:[%s697_s16 + $0x18] sm:$0xff] %v386_v32  ;;  %v351_v34 = vpop.f32.mrf.mxu2 }
  0xa6   : > { %v352_v35 = vadd.f32 %v351_v34, %v301_v33  ;;  %v380_v36 = vpop.f32.mrf.mxu3 }
  0xa7   : > { %v381_v37 = vadd.f32 %v380_v36, %v301_v33 }
  0xa8   : > { %v389_v38 = vmax.f32 %v352_v35, 0.0 }
  0xa9   : > { %v390_v39 = vmax.f32 %v381_v37, 0.0 }
  0xaa   : > { %397 = vst [vmem:[%s697_s16 + $0x30] sm:$0xff] %v389_v38 }
  0xab   : > { %398 = vst [vmem:[%s697_s16 + $0x38] sm:$0xff] %v390_v39 }
  0xac PF: > { %s13_s14 = sadd.s32 1, %s614_s14   ;;  %s720_s12 = smov %s610_s13 }
  0xad   : > { %p10_p5 = scmp.ge.s32.totalorder %s13_s14, 4   ;;  %s721_s13 = smov %s723_s15 }
  0xaf   :  { %12 = sbr.rel (!%p10_p5) target bundleno = 2 (0x2), region = 68 }

// kernel: cfdg_forward.3
= control target key start
LH: loop header
LB: loop body
LE: loop exit
PB: predicated region body
PF: predicated region fallthrough
CT: control target
= control target key end

     0   :  { %s350_s12 = smov 0   ;;  %s367_s0 = inlined_call_operand.vmem [shape: f32[4,2,8], index: 0, kind: input, shape index: {}]   ;;  %s368_s1 = inlined_call_operand.vmem [shape: f32[4,8,128], index: 1, kind: input, shape index: {}]   ;;  %s369_s2 = inlined_call_operand.vmem [shape: f32[4,1,128], index: 2, kind: input, shape index: {}]   ;;  %s370_s3 = inlined_call_operand.vmem [shape: f32[4,2,128], index: 3, kind: output, shape index: {}]  }
   0x1 LB: > { %s302_s13 = sadd.s32 4294967295, %s328_s12   ;;  %p306_p0 = scmp.ge.s32.totalorder %s328_s12, 1  ;;  %s328_s12 = sphi %s350_s12, %s13_s12  }
   0x2   : > { %p153_p1 = scmp.lt.s32.totalorder %s328_s12, 5 }
   0x4   : > { %p154_p2 = pnand %p306_p0, %p153_p1 }
   0x5   : > { %p182_p3 = scmp.lt.s32.totalorder (!%p154_p2), %s302_s13, 3 }
   0x6   : > { %157 = sbr.rel (%p154_p2) target bundleno = 145 (0x91), region = 32 }
   0xb   : > { %s372_s13 = smov (!%p182_p3, %s302_s13), 3  ;;  %vm203_vm0 = vcmask 64512  }
   0xc   : > { %s308_s14 = sshll.u32 %s372_s13, 3  ;;  %s307_s15 = sshll.u32 %s372_s13, 1 }
   0xd   : > { %s189_s18 = scalar_lea.vmem %s368_s1, %s308_s14  ;;  %s185_s21 = scalar_lea.vmem %s367_s0, %s307_s15 }
   0xe   : > { %v198_v0 = vld [vmem:[%s189_s18] sm:$0xff]  ;;  %s192_s24 = scalar_lea.vmem %s369_s2, %s372_s13  ;;  %s196_s27 = scalar_lea.vmem %s370_s3, %s307_s15 }
   0xf   : > { %v197_v1 = vld [vmem:[%s185_s21] sm:$0x3]  ;;  %222 = vmatpush.msra.mxu0 %v198_v0 }
  0x10   : > { %310 = vmatmul.msk.f32.vlgmr.msra.gmra.mxu0 %vm203_vm0, %v197_v1  ;;  %v321_v2 = vld [vmem:[%s192_s24] ss:$0 sm:$0xff] }
  0x8d   : > { %v224_v3 = vpop.f32.mrf.mxu0 }
  0x8e   : > { %v225_v4 = vadd.f32 %v321_v2, %v224_v3 }
  0x90   : > { %227 = vst [vmem:[%s196_s27] sm:$0x3] %v225_v4 }
  0x91 PF: > { %s13_s12 = sadd.s32 1, %s328_s12  }
  0x92   : > { %p10_p4 = scmp.ge.s32.totalorder %s13_s12, 6  }
  0x94   :  { %12 = sbr.rel (!%p10_p4) target bundleno = 1 (0x1), region = 68 }

</bundles_post_ra>
